<compile_context>
chip_gen: v7x
topology: tpu7x:2x2x1
jax: 0.10.0
libtpu: 0.0.40
codegen_flags: <defaults>
</compile_context>

<pallas_src>
import math
from functools import partial

import numpy as np
import jax
import jax.numpy as jnp
from jax.experimental import pallas as pl
from jax.experimental.pallas import tpu as pltpu


def _round_up(n: int, m: int) -> int:
    return ((n + m - 1) // m) * m


def kaiser_sinc_filter1d(cutoff: float, half_width: float, kernel_size: int) -> np.ndarray:
    """Deterministic filter init, mirroring the PyTorch buffer (shape (K,))."""
    even = kernel_size % 2 == 0
    half_size = kernel_size // 2
    delta_f = 4 * half_width
    A = 2.285 * (half_size - 1) * math.pi * delta_f + 7.95
    if A > 50.0:
        beta = 0.1102 * (A - 8.7)
    elif A >= 21.0:
        beta = 0.5842 * (A - 21) ** 0.4 + 0.07886 * (A - 21.0)
    else:
        beta = 0.0
    window = np.kaiser(kernel_size, beta)                 # == torch.kaiser_window(periodic=False)
    if even:
        time = np.arange(-half_size, half_size) + 0.5
    else:
        time = np.arange(kernel_size) - half_size
    if cutoff == 0:
        filt = np.zeros_like(time, dtype=np.float64)
    else:
        filt = 2 * cutoff * window * np.sinc(2 * cutoff * time)
        filt = filt / filt.sum()
    return filt.astype(np.float32)


@partial(jax.jit, static_argnames=("ratio", "kernel_size", "row_tile", "t_tile"))
def downsample1d(x: jax.Array, ratio: int = 2, kernel_size=None,
                 row_tile: int = 256, t_tile: int = 512) -> jax.Array:
    """Equivalent of DownSample1d(ratio).forward(x) for x of shape (B, C, T)."""
    K = int(6 * ratio // 2) * 2 if kernel_size is None else kernel_size
    filt = kaiser_sinc_filter1d(0.5 / ratio, 0.6 / ratio, K)      # (K,) numpy, static

    even = K % 2 == 0
    pad_left = K // 2 - int(even)
    pad_right = K // 2

    B, C, T = x.shape
    BC = B * C
    T_pad = T + pad_left + pad_right
    T_out = (T_pad - K) // ratio + 1

    M = -(-K // ratio)                                    # taps per phase (max)
    n_taps = [(K - 1 - r) // ratio + 1 for r in range(ratio)]

    # ---- tile sizing ------------------------------------------------------
    # Output time tile: multiple of 128 lanes -> unmasked full-width stores.
    Tblk = min(_round_up(max(t_tile, 128), 128), _round_up(T_out, 128))
    n_tb = -(-T_out // Tblk)
    T_out_pad = n_tb * Tblk
    Lblk_h = Tblk + M - 1                                 # phase samples incl. halo

    # Row tile over flattened (B*C): sublane-aligned, clamped for small inputs.
    ROW = _round_up(min(max(row_tile, 8), _round_up(BC, 8)), 8)
    BC_pad = _round_up(BC, ROW)

    # ---- single-pass gather: pad(edge) + polyphase split + halo tiling ----
    # phases_t[j, r, bc, q] = x_clamped[bc, (j*Tblk + q)*ratio + r - pad_left]
    # Clamping the source index to [0, T-1] IS the replicate padding; columns
    # past T_out in the last time block are clipped garbage that is never kept.
    x_flat = x.reshape(BC, T)
    if BC_pad > BC:
        x_flat = jnp.pad(x_flat, ((0, BC_pad - BC), (0, 0)))
    jj = jnp.arange(n_tb, dtype=jnp.int32)[:, None, None]
    rr = jnp.arange(ratio, dtype=jnp.int32)[None, :, None]
    qq = jnp.arange(Lblk_h, dtype=jnp.int32)[None, None, :]
    src = (jj * Tblk + qq) * ratio + rr - pad_left        # (n_tb, ratio, Lblk_h)
    src = jnp.clip(src, 0, T - 1)
    gathered = jnp.take(x_flat, src, axis=1)              # (BC_pad, n_tb, ratio, Lblk_h)
    phases_t = jnp.transpose(gathered, (1, 2, 0, 3))      # (n_tb, ratio, BC_pad, Lblk_h)

    taps = [float(v) for v in np.asarray(filt)]

    # ---- kernel -----------------------------------------------------------
    def kernel(ph_ref, o_ref):
        # ph_ref: (1, ratio, ROW, Lblk_h) VMEM block; o_ref: (ROW, Tblk).
        acc = jnp.zeros((ROW, Tblk), jnp.float32)
        for r in range(ratio):                            # static: K taps total
            pr = ph_ref[0, r, :, :].astype(jnp.float32)   # load each phase once
            for m in range(n_taps[r]):
                acc = acc + taps[m * ratio + r] * pr[:, m:m + Tblk]
        o_ref[...] = acc.astype(o_ref.dtype)

    out = pl.pallas_call(
        kernel,
        out_shape=jax.ShapeDtypeStruct((BC_pad, T_out_pad), x.dtype),
        grid=(BC_pad // ROW, n_tb),
        in_specs=[pl.BlockSpec((1, ratio, ROW, Lblk_h), lambda i, j: (j, 0, i, 0))],
        out_specs=pl.BlockSpec((ROW, Tblk), lambda i, j: (i, j)),
        compiler_params=pltpu.CompilerParams(
            dimension_semantics=("parallel", "parallel"),
            vmem_limit_bytes=48 * 1024 * 1024,
        ),
    )(phases_t)

    return out[:BC, :T_out].reshape(B, C, T_out)


def _reference_downsample(x_np: np.ndarray, ratio: int = 2) -> np.ndarray:
    """Pure-numpy reference reproducing the PyTorch forward semantics."""
    K = int(6 * ratio // 2) * 2
    filt = kaiser_sinc_filter1d(0.5 / ratio, 0.6 / ratio, K)
    even = K % 2 == 0
    pad_left = K // 2 - int(even)
    pad_right = K // 2
    xp = np.pad(x_np, ((0, 0), (0, 0), (pad_left, pad_right)), mode="edge")
    B, C, T_pad = xp.shape
    T_out = (T_pad - K) // ratio + 1
    y = np.zeros((B, C, T_out), dtype=np.float32)
    for t in range(T_out):
        y[..., t] = np.sum(xp[..., t * ratio: t * ratio + K] * filt, axis=-1)
    return y


if __name__ == "__main__":
    key = jax.random.PRNGKey(0)
    B, C, T = 2, 4, 16
    x = jax.random.normal(key, (B, C, T), dtype=jnp.float32)

    y = downsample1d(x, ratio=2)
    y = jax.block_until_ready(y)

    y_ref = _reference_downsample(np.asarray(x), ratio=2)
    assert y.shape == (B, C, T // 2), y.shape
    np.testing.assert_allclose(np.asarray(y), y_ref, rtol=1e-5, atol=1e-5)
    print("KERNEL_OK")
</pallas_src>

<mosaic_0001>
module attributes {stable_mosaic.version = 11 : i64} {
  func.func @kernel(%arg0: i32, %arg1: i32, %arg2: memref<1x2x8x133xf32, #tpu.memory_space<vmem>>, %arg3: memref<8x128xf32, #tpu.memory_space<vmem>>) attributes {dimension_semantics = [#tpu.dimension_semantics<parallel>, #tpu.dimension_semantics<parallel>], iteration_bounds = array<i64: 1, 1>, scalar_prefetch = 0 : i64, scratch_operands = 0 : i64, tpu.core_type = #tpu.core_type<tc>, window_params = [{transform_indices = @transform_0, window_bounds = array<i64: 1, 2, 8, 133>}, {transform_indices = @transform_1, window_bounds = array<i64: 8, 128>}]} {
    %cst = arith.constant 0.000000e+00 : f32
    %0 = vector.broadcast %cst : f32 to vector<8x128xf32>
    %c0 = arith.constant 0 : index
    %c0_0 = arith.constant 0 : index
    %c0_1 = arith.constant 0 : index
    %c0_2 = arith.constant 0 : index
    %1 = vector.load %arg2[%c0, %c0_0, %c0_1, %c0_2] : memref<1x2x8x133xf32, #tpu.memory_space<vmem>>, vector<1x1x8x133xf32>
    %2 = vector.shape_cast %1 : vector<1x1x8x133xf32> to vector<8x133xf32>
    %3 = vector.extract_strided_slice %2 {offsets = [0, 0], sizes = [8, 128], strides = [1, 1]} : vector<8x133xf32> to vector<8x128xf32>
    %cst_3 = arith.constant 0.00202896656 : f32
    %4 = vector.broadcast %cst_3 : f32 to vector<8x128xf32>
    %5 = arith.mulf %4, %3 : vector<8x128xf32>
    %6 = arith.addf %0, %5 : vector<8x128xf32>
    %7 = vector.extract_strided_slice %2 {offsets = [0, 1], sizes = [8, 128], strides = [1, 1]} : vector<8x133xf32> to vector<8x128xf32>
    %cst_4 = arith.constant -0.0255434643 : f32
    %8 = vector.broadcast %cst_4 : f32 to vector<8x128xf32>
    %9 = arith.mulf %8, %7 : vector<8x128xf32>
    %10 = arith.addf %6, %9 : vector<8x128xf32>
    %11 = vector.extract_strided_slice %2 {offsets = [0, 2], sizes = [8, 128], strides = [1, 1]} : vector<8x133xf32> to vector<8x128xf32>
    %cst_5 = arith.constant 0.128572613 : f32
    %12 = vector.broadcast %cst_5 : f32 to vector<8x128xf32>
    %13 = arith.mulf %12, %11 : vector<8x128xf32>
    %14 = arith.addf %10, %13 : vector<8x128xf32>
    %15 = vector.extract_strided_slice %2 {offsets = [0, 3], sizes = [8, 128], strides = [1, 1]} : vector<8x133xf32> to vector<8x128xf32>
    %cst_6 = arith.constant 0.443209797 : f32
    %16 = vector.broadcast %cst_6 : f32 to vector<8x128xf32>
    %17 = arith.mulf %16, %15 : vector<8x128xf32>
    %18 = arith.addf %14, %17 : vector<8x128xf32>
    %19 = vector.extract_strided_slice %2 {offsets = [0, 4], sizes = [8, 128], strides = [1, 1]} : vector<8x133xf32> to vector<8x128xf32>
    %cst_7 = arith.constant -0.0576573759 : f32
    %20 = vector.broadcast %cst_7 : f32 to vector<8x128xf32>
    %21 = arith.mulf %20, %19 : vector<8x128xf32>
    %22 = arith.addf %18, %21 : vector<8x128xf32>
    %23 = vector.extract_strided_slice %2 {offsets = [0, 5], sizes = [8, 128], strides = [1, 1]} : vector<8x133xf32> to vector<8x128xf32>
    %cst_8 = arith.constant 0.00938946381 : f32
    %24 = vector.broadcast %cst_8 : f32 to vector<8x128xf32>
    %25 = arith.mulf %24, %23 : vector<8x128xf32>
    %26 = arith.addf %22, %25 : vector<8x128xf32>
    %c0_9 = arith.constant 0 : index
    %c1 = arith.constant 1 : index
    %c0_10 = arith.constant 0 : index
    %c0_11 = arith.constant 0 : index
    %27 = vector.load %arg2[%c0_9, %c1, %c0_10, %c0_11] : memref<1x2x8x133xf32, #tpu.memory_space<vmem>>, vector<1x1x8x133xf32>
    %28 = vector.shape_cast %27 : vector<1x1x8x133xf32> to vector<8x133xf32>
    %29 = vector.extract_strided_slice %28 {offsets = [0, 0], sizes = [8, 128], strides = [1, 1]} : vector<8x133xf32> to vector<8x128xf32>
    %cst_12 = arith.constant 0.00938946381 : f32
    %30 = vector.broadcast %cst_12 : f32 to vector<8x128xf32>
    %31 = arith.mulf %30, %29 : vector<8x128xf32>
    %32 = arith.addf %26, %31 : vector<8x128xf32>
    %33 = vector.extract_strided_slice %28 {offsets = [0, 1], sizes = [8, 128], strides = [1, 1]} : vector<8x133xf32> to vector<8x128xf32>
    %cst_13 = arith.constant -0.0576573759 : f32
    %34 = vector.broadcast %cst_13 : f32 to vector<8x128xf32>
    %35 = arith.mulf %34, %33 : vector<8x128xf32>
    %36 = arith.addf %32, %35 : vector<8x128xf32>
    %37 = vector.extract_strided_slice %28 {offsets = [0, 2], sizes = [8, 128], strides = [1, 1]} : vector<8x133xf32> to vector<8x128xf32>
    %cst_14 = arith.constant 0.443209797 : f32
    %38 = vector.broadcast %cst_14 : f32 to vector<8x128xf32>
    %39 = arith.mulf %38, %37 : vector<8x128xf32>
    %40 = arith.addf %36, %39 : vector<8x128xf32>
    %41 = vector.extract_strided_slice %28 {offsets = [0, 3], sizes = [8, 128], strides = [1, 1]} : vector<8x133xf32> to vector<8x128xf32>
    %cst_15 = arith.constant 0.128572613 : f32
    %42 = vector.broadcast %cst_15 : f32 to vector<8x128xf32>
    %43 = arith.mulf %42, %41 : vector<8x128xf32>
    %44 = arith.addf %40, %43 : vector<8x128xf32>
    %45 = vector.extract_strided_slice %28 {offsets = [0, 4], sizes = [8, 128], strides = [1, 1]} : vector<8x133xf32> to vector<8x128xf32>
    %cst_16 = arith.constant -0.0255434643 : f32
    %46 = vector.broadcast %cst_16 : f32 to vector<8x128xf32>
    %47 = arith.mulf %46, %45 : vector<8x128xf32>
    %48 = arith.addf %44, %47 : vector<8x128xf32>
    %49 = vector.extract_strided_slice %28 {offsets = [0, 5], sizes = [8, 128], strides = [1, 1]} : vector<8x133xf32> to vector<8x128xf32>
    %cst_17 = arith.constant 0.00202896656 : f32
    %50 = vector.broadcast %cst_17 : f32 to vector<8x128xf32>
    %51 = arith.mulf %50, %49 : vector<8x128xf32>
    %52 = arith.addf %48, %51 : vector<8x128xf32>
    %c0_18 = arith.constant 0 : index
    %c0_19 = arith.constant 0 : index
    %53 = vector.load %arg3[%c0_18, %c0_19] : memref<8x128xf32, #tpu.memory_space<vmem>>, vector<8x128xf32>
    tpu.vector_store %arg3[%c0_18, %c0_19], %52 {strides = array<i32>} : memref<8x128xf32, #tpu.memory_space<vmem>>, vector<8x128xf32>,
    return
  }
  func.func @transform_0(%arg0: i32, %arg1: i32) -> (i32, i32, i32, i32) {
    %c0_i32 = arith.constant 0 : i32
    %c0_i32_0 = arith.constant 0 : i32
    %c0_i32_1 = arith.constant 0 : i32
    return %arg1, %c0_i32, %arg0, %c0_i32_0 : i32, i32, i32, i32
  }
  func.func @transform_1(%arg0: i32, %arg1: i32) -> (i32, i32) {
    %c0_i32 = arith.constant 0 : i32
    return %arg0, %arg1 : i32, i32
  }
}

</mosaic_0001>

<bundles_post_ra>
// kernel: downsample1d.1
= control target key start
LH: loop header
LB: loop body
LE: loop exit
PB: predicated region body
PF: predicated region fallthrough
CT: control target
= control target key end

     0   :  { %s180_s10 = smov 126   ;;  %s181_s11 = smov 127   ;;  %s234_s0 = inlined_call_operand.vmem [shape: f32[1,2,8,133], index: 0, kind: input, shape index: {}]   ;;  %s235_s1 = inlined_call_operand.hbm [shape: f32[8,128], index: 1, kind: output, shape index: {}]  }
   0x1   :  { %v9_v0 = vld [vmem:[%s234_s0] sm:$0xff]  ;;  %v10_v1 = vld [vmem:[%s234_s0 + $0x8] sm:$0xff] }
   0x2   :  { %v25_v2 = vmul.f32 0.12857261, %v9_v0  ;;  %v13_v3 = vmul.f32 -0.025543464, %v9_v0  ;;  %v26_v4 = vmul.f32 0.12857261, %v10_v1 }
   0x3   :  { %v14_v5 = vmul.f32 -0.025543464, %v10_v1  ;;  %v38_v6 = vmul.f32 0.4432098, %v10_v1  ;;  %v37_v7 = vmul.f32 0.4432098, %v9_v0 }
   0x4   :  { %29 = vrot.lane.b32.xlu1 %v25_v2, %s180_s10  ;;  %17 = vrot.lane.b32.xlu0 %v13_v3, %s181_s11 }
   0x8   :  { %31 = vrot.lane.b32.xlu1 %v26_v4, %s180_s10  ;;  %19 = vrot.lane.b32.xlu0 %v14_v5, %s181_s11 }
   0x9   :  { %6 = vsyncpa [#allocation3], 0  ;;  %s182_s12 = smov 125   ;;  %v50_v8 = vmul.f32 -0.057657376, %v10_v1  ;;  %s183_s13 = smov 124  }
   0xa   :  { %v49_v9 = vmul.f32 -0.057657376, %v9_v0  ;;  %v62_v10 = vmul.f32 0.009389464, %v10_v1  ;;  %v61_v11 = vmul.f32 0.009389464, %v9_v0 }
   0xb   :  { %v149_v12 = vld [vmem:[%s234_s0 + $0x18] sm:$0xff]  ;;  %v148_v13 = vld [vmem:[%s234_s0 + $0x10] sm:$0xff]  ;;  %s184_s18 = smov 123   ;;  %vm21_vm0 = vcmask 1039360   ;;  %v11_v26 = vmul.f32 0.0020289666, %v9_v0 }
   0xc   :  { %43 = vrot.lane.b32.xlu1 %v38_v6, %s182_s12  ;;  %41 = vrot.lane.b32.xlu0 %v37_v7, %s182_s12  ;;  %v79_v14 = vmul.f32 -0.057657376, %v149_v12  ;;  %v78_v15 = vmul.f32 -0.057657376, %v148_v13  ;;  %v90_v16 = vmul.f32 0.4432098, %v149_v12 }
   0xd   :  { %v89_v17 = vmul.f32 0.4432098, %v148_v13  ;;  %v101_v18 = vmul.f32 0.12857261, %v149_v12  ;;  %v100_v19 = vmul.f32 0.12857261, %v148_v13 }
   0xe   :  { %v112_v20 = vmul.f32 -0.025543464, %v149_v12  ;;  %v111_v21 = vmul.f32 -0.025543464, %v148_v13  ;;  %v123_v22 = vmul.f32 0.0020289666, %v149_v12 }
   0xf   :  { %v122_v23 = vmul.f32 0.0020289666, %v148_v13  ;;  %vm33_vm1 = vcmask 1031168   ;;  %vm45_vm2 = vcmask 1022976   ;;  %vm57_vm3 = vcmask 1014784   ;;  %s185_s0 = smov [#allocation2]  }
  0x10   :  { %55 = vrot.lane.b32.xlu1 %v50_v8, %s183_s13  ;;  %53 = vrot.lane.b32.xlu0 %v49_v9, %s183_s13  ;;  %vm69_vm4 = vcmask 1006592   ;;  %v76_v43 = vmul.f32 0.009389464, %v148_v13  ;;  %s140_s19 = sshll.u32 %s185_s0, 4  ;;  %s141_s19 = int_to_ptr.vmem [resolvable:$true] %s140_s19 }
  0x11   :  { %s156_s20 = scalar_lea.vmem %s141_s19, 128  ;;  %p161_p1 = scmp.lt.s32.totalorder %s141_s19, %s141_s19 }
  0x12   :  { %p157_p0 = scmp.ne.s32.totalorder %s141_s19, %s156_s20  ;;  %p162_p2 = scmp.lt.s32.totalorder %s156_s20, %s156_s20 }
  0x14   :  { %67 = vrot.lane.b32.xlu1 %v62_v10, %s184_s18  ;;  %65 = vrot.lane.b32.xlu0 %v61_v11, %s184_s18  ;;  %p163_p3 = por %p162_p2, %p161_p1 }
  0x16   :  { %p164_p4 = pnand %p163_p3, %p157_p0 }
  0x18   :  { %84 = vrot.lane.b32.xlu1 %v79_v14, %s181_s11  ;;  %82 = vrot.lane.b32.xlu0 %v78_v15, %s181_s11 }
  0x1c   :  { %95 = vrot.lane.b32.xlu1 %v90_v16, %s180_s10  ;;  %93 = vrot.lane.b32.xlu0 %v89_v17, %s180_s10 }
  0x20   :  { %106 = vrot.lane.b32.xlu1 %v101_v18, %s182_s12  ;;  %104 = vrot.lane.b32.xlu0 %v100_v19, %s182_s12 }
  0x24   :  { %117 = vrot.lane.b32.xlu1 %v112_v20, %s183_s13  ;;  %115 = vrot.lane.b32.xlu0 %v111_v21, %s183_s13 }
  0x28   :  { %128 = vrot.lane.b32.xlu1 %v123_v22, %s184_s18  ;;  %126 = vrot.lane.b32.xlu0 %v122_v23, %s184_s18 }
  0x76   :  { %v30_v24 = vpop.permute.xlu1 %29  ;;  %v18_v25 = vpop.permute.xlu0 %17 }
  0x7a   :  { %v32_v27 = vpop.permute.xlu1 %31  ;;  %v20_v28 = vpop.permute.xlu0 %19 }
  0x7b   :  { %v22_v29 = vsel %vm21_vm0, %v18_v25, %v20_v28  ;;  %v34_v33 = vsel %vm33_vm1, %v30_v24, %v32_v27 }
  0x7c   :  { %v24_v30 = vadd.f32 %v22_v29, %v11_v26 }
  0x7e   :  { %v44_v31 = vpop.permute.xlu1 %43  ;;  %v42_v32 = vpop.permute.xlu0 %41  ;;  %v36_v34 = vadd.f32 %v34_v33, %v24_v30 }
  0x7f   :  { %v46_v35 = vsel %vm45_vm2, %v42_v32, %v44_v31 }
  0x80   :  { %v48_v39 = vadd.f32 %v46_v35, %v36_v34 }
  0x82   :  { %v56_v36 = vpop.permute.xlu1 %55  ;;  %v54_v37 = vpop.permute.xlu0 %53 }
  0x83   :  { %v58_v38 = vsel %vm57_vm3, %v54_v37, %v56_v36 }
  0x84   :  { %v60_v40 = vadd.f32 %v58_v38, %v48_v39 }
  0x86   :  { %v68_v41 = vpop.permute.xlu1 %67  ;;  %v66_v42 = vpop.permute.xlu0 %65 }
  0x87   :  { %v70_v44 = vsel %vm69_vm4, %v66_v42, %v68_v41 }
  0x88   :  { %v72_v45 = vadd.f32 %v70_v44, %v60_v40 }
  0x8a   :  { %v85_v46 = vpop.permute.xlu1 %84  ;;  %v83_v47 = vpop.permute.xlu0 %82  ;;  %v77_v48 = vadd.f32 %v76_v43, %v72_v45 }
  0x8b   :  { %v86_v51 = vsel %vm21_vm0, %v83_v47, %v85_v46 }
  0x8c   :  { %v88_v55 = vadd.f32 %v86_v51, %v77_v48 }
  0x8e   :  { %v96_v49 = vpop.permute.xlu1 %95  ;;  %v94_v50 = vpop.permute.xlu0 %93 }
  0x8f   :  { %v97_v54 = vsel %vm33_vm1, %v94_v50, %v96_v49 }
  0x90   :  { %v99_v57 = vadd.f32 %v97_v54, %v88_v55 }
  0x92   :  { %v107_v52 = vpop.permute.xlu1 %106  ;;  %v105_v53 = vpop.permute.xlu0 %104 }
  0x93   :  { %v108_v56 = vsel %vm45_vm2, %v105_v53, %v107_v52 }
  0x94   :  { %v110_v61 = vadd.f32 %v108_v56, %v99_v57 }
  0x96   :  { %v118_v58 = vpop.permute.xlu1 %117  ;;  %v116_v59 = vpop.permute.xlu0 %115 }
  0x97   :  { %v119_v60 = vsel %vm57_vm3, %v116_v59, %v118_v58 }
  0x98   :  { %v121_v62 = vadd.f32 %v119_v60, %v110_v61 }
  0x9a   :  { %v129_v63 = vpop.permute.xlu1 %128  ;;  %v127_v0 = vpop.permute.xlu0 %126 }
  0x9b   :  { %v130_v1 = vsel %vm69_vm4, %v127_v0, %v129_v63 }
  0x9c   :  { %v132_v2 = vadd.f32 %v130_v1, %v121_v62 }
  0x9e   :  { %133 = vst [vmem:[#allocation2] sm:$0xff] %v132_v2 }
  0x9f   :  { %167 = shalt.err (!%p164_p4)
}
  0xa0   :  { %s168_s23 = scalar_lea.hbm %s235_s1, 128 }
  0xa1   :  { %p169_p5 = scmp.ne.s32.totalorder %s235_s1, %s168_s23  ;;  %p172_p6 = scmp.lt.u32.totalorder %s168_s23, %s235_s1 }
  0xa3   :  { %p174_p7 = pnand %p172_p6, %p169_p5 }
  0xa5   :  { %177 = shalt.err (!%p174_p7)
}
  0xa6   :  { %143 = dma.vmem_to_hbm [thread:$0]  %s141_s19, 128, %s235_s1, [#allocation3]  }
  0xa7   :  { %178 = dma.done.wait [#allocation3], 128  }
  0xa8   :  { %179 = vsyncadd [#allocation3], 4294967168 }
  0xa9   :  { %147 = vsyncpa [#allocation3], 1 }

</bundles_post_ra>
